<compile_context>
chip_gen: v7x
topology: tpu7x:2x2x1
jax: 0.10.0
libtpu: 0.0.40
codegen_flags: <defaults>
</compile_context>

<pallas_src>
import math
import functools

import jax
import jax.numpy as jnp
from jax import lax
from jax.experimental import pallas as pl
from jax.experimental.pallas import tpu as pltpu


def _encoder_block_kernel(x_ref, actq_ref, actk_ref, w_ref, vec_ref, o_ref, *,
                          num_heads, head_size, d_model, d_ff, eps, offs):
    f32 = jnp.float32
    bf16 = jnp.bfloat16
    F = num_heads * head_size
    S = x_ref.shape[1]

    x = x_ref[0]                                   # (S, D) f32
    xb = x.astype(bf16)

    # ---- static sub-views of the packed weight slab (bf16) ------------------
    o_qkv, o_out, o_ff1, o_ff2 = offs
    w_qkv = w_ref[o_qkv:o_qkv + d_model, 0:3 * F]          # (D, 3F)
    w_out = w_ref[o_out:o_out + F, 0:d_model]              # (F, D)
    w_ff1 = w_ref[o_ff1:o_ff1 + d_model, 0:d_ff]           # (D, d_ff)
    w_ff2 = w_ref[o_ff2:o_ff2 + d_ff, 0:d_model]           # (d_ff, D)
    vec = vec_ref[...]                                     # (8, P) f32

    # ---- fused QKV projection (one MXU matmul) -------------------------------
    qkv = jnp.dot(xb, w_qkv, preferred_element_type=f32) + vec[0:1, :3 * F]

    # ---- attention mask built in-kernel from active vectors + iota -----------
    a_q = actq_ref[0]                              # (S, 1) query-side active
    a_k = actk_ref[0]                              # (1, S) key-side active
    row = lax.broadcasted_iota(jnp.int32, (S, S), 0)
    col = lax.broadcasted_iota(jnp.int32, (S, S), 1)
    keep = (a_q > 0.5) & (a_k > 0.5) & (row >= col)        # (S, S)
    neg = f32(-1e9)
    scale = f32(1.0 / math.sqrt(head_size))

    # ---- multi-head attention; heads collected into one (S, F) buffer --------
    heads = []
    for h in range(num_heads):                     # static unroll
        lo = h * head_size
        qh = qkv[:, lo:lo + head_size].astype(bf16)
        kh = qkv[:, F + lo:F + lo + head_size].astype(bf16)
        vh = qkv[:, 2 * F + lo:2 * F + lo + head_size].astype(bf16)

        s = lax.dot_general(qh, kh, (((1,), (1,)), ((), ())),
                            preferred_element_type=f32) * scale
        s = jnp.where(keep, s, neg)
        smax = jnp.max(s, axis=-1, keepdims=True)
        e = jnp.exp(s - smax)
        p = e * pl.reciprocal(jnp.sum(e, axis=-1, keepdims=True), approx=True)
        heads.append(jnp.dot(p.astype(bf16), vh, preferred_element_type=f32))
    ctx = jnp.concatenate(heads, axis=-1)                  # (S, F) f32

    # single deep K=F dot through final_layer (replaces 4 shallow K=8 folds)
    attn = (jnp.dot(ctx.astype(bf16), w_out, preferred_element_type=f32)
            + vec[1:2, :d_model])

    # ---- custom LayerNorm (torch.std: unbiased /(D-1), eps added to std) -----
    inv_d = f32(1.0 / d_model)
    inv_dm1 = f32(1.0 / (d_model - 1))

    def layer_norm(v, w_row, b_row):
        mean = jnp.sum(v, axis=-1, keepdims=True) * inv_d
        c = v - mean
        std = jnp.sqrt(jnp.sum(c * c, axis=-1, keepdims=True) * inv_dm1)
        return w_row * c * pl.reciprocal(std + eps) + b_row

    h1 = layer_norm(attn + x, vec[2:3, :d_model], vec[3:4, :d_model])

    # ---- position-wise feed-forward (1x1 convs == pointwise linears) ---------
    f1 = (jnp.dot(h1.astype(bf16), w_ff1, preferred_element_type=f32)
          + vec[4:5, :d_ff])
    f1 = jnp.maximum(f1, f32(0.0))
    f2 = (jnp.dot(f1.astype(bf16), w_ff2, preferred_element_type=f32)
          + vec[5:6, :d_model])

    out = layer_norm(f2 + h1, vec[6:7, :d_model], vec[7:8, :d_model])
    o_ref[0] = out.astype(o_ref.dtype)


def pack_params(params, *, num_heads, head_size, d_model, d_ff):
    """One-time packing (kept out of the per-call path): every matmul weight
    goes into ONE lane-padded bf16 slab (static row offsets); every bias /
    LayerNorm vector into one (8, P) f32 slab."""
    F = num_heads * head_size
    f32, bf16 = jnp.float32, jnp.bfloat16

    mats = [
        jnp.concatenate([params["wq"].T, params["wk"].T, params["wv"].T],
                        axis=1),                     # (D, 3F) fused QKV
        params["wf"].T,                              # (F, D)  final_layer
        params["w_conv1"].T,                         # (D, d_ff)
        params["w_conv2"].T,                         # (d_ff, D)
    ]
    lanes = max(3 * F, d_model, d_ff)
    lanes = ((lanes + 127) // 128) * 128             # lane-align slab width

    offs, rows, padded = [], 0, []
    for m in mats:
        offs.append(rows)
        rows += m.shape[0]
        padded.append(jnp.pad(m.astype(f32), ((0, 0), (0, lanes - m.shape[1]))))
    total = ((rows + 7) // 8) * 8                    # sublane-align row count
    w_slab = jnp.concatenate(padded, axis=0)
    w_slab = jnp.pad(w_slab, ((0, total - rows), (0, 0))).astype(bf16)

    def row(v):
        v = jnp.asarray(v, f32).reshape(-1)
        return jnp.pad(v, (0, lanes - v.shape[0]))

    vec = jnp.stack([
        row(jnp.concatenate([params["bq"], params["bk"], params["bv"]])),
        row(params["bf"]),
        row(params["ln1_w"]), row(params["ln1_b"]),
        row(params["b_conv1"]), row(params["b_conv2"]),
        row(params["ln2_w"]), row(params["ln2_b"]),
    ])                                               # (8, lanes) f32

    return {"w_slab": w_slab, "vec": vec, "offs": tuple(offs)}


def transformer_encoder_block(x, active_entries, packed, *, num_heads,
                              head_size, d_ff, eps=1e-6):
    """x: [B, S, D] f32, active_entries: [B, S, 1]. Returns [B, S, D]."""
    B, S, D = x.shape
    F = num_heads * head_size

    act = active_entries.reshape(B, S).astype(jnp.float32)
    act_q = act.reshape(B, S, 1)        # query-side (sublane) orientation
    act_k = act.reshape(B, 1, S)        # key-side   (lane)    orientation

    w_slab, vec = packed["w_slab"], packed["vec"]

    kernel = functools.partial(
        _encoder_block_kernel, num_heads=num_heads, head_size=head_size,
        d_model=D, d_ff=d_ff, eps=eps, offs=packed["offs"])

    flops = B * (2 * S * D * 3 * F                       # fused QKV
                 + num_heads * 4 * S * S * head_size     # scores + P@V
                 + 2 * S * F * D                         # final_layer
                 + 4 * S * D * d_ff)                     # FFN
    bytes_accessed = ((x.size + act_q.size + act_k.size + vec.size
                       + B * S * D) * 4 + w_slab.size * 2)
    cost = pl.CostEstimate(flops=flops,
                           transcendentals=B * num_heads * S * S,
                           bytes_accessed=bytes_accessed)

    out = pl.pallas_call(
        kernel,
        out_shape=jax.ShapeDtypeStruct((B, S, D), x.dtype),
        grid=(B,),
        in_specs=[
            pl.BlockSpec((1, S, D), lambda b: (b, 0, 0)),   # x block
            pl.BlockSpec((1, S, 1), lambda b: (b, 0, 0)),   # active (col)
            pl.BlockSpec((1, 1, S), lambda b: (b, 0, 0)),   # active (row)
            pl.BlockSpec(w_slab.shape, lambda b: (0, 0)),   # weights, resident
            pl.BlockSpec(vec.shape, lambda b: (0, 0)),      # bias/LN, resident
        ],
        out_specs=pl.BlockSpec((1, S, D), lambda b: (b, 0, 0)),
        compiler_params=pltpu.CompilerParams(
            dimension_semantics=("parallel",)),
        cost_estimate=cost,
    )(x, act_q, act_k, w_slab, vec)
    return out


def _reference(x, active_entries, params, *, num_heads, head_size, eps=1e-6):
    """Pure-JAX replica of TransformerEncoderBlock.forward (eval mode)."""
    B, S, D = x.shape
    F = num_heads * head_size

    def lin(a, w, b):
        return a @ w.T + b

    def split_heads(a):
        return a.reshape(B, S, num_heads, head_size).transpose(0, 2, 1, 3)

    q = split_heads(lin(x, params["wq"], params["bq"]))
    k = split_heads(lin(x, params["wk"], params["bk"]))
    v = split_heads(lin(x, params["wv"], params["bv"]))

    act = active_entries.reshape(B, S)
    mask = act[:, None, :, None] * act[:, None, None, :]      # (B,1,S,S)

    scores = jnp.einsum("bhqd,bhkd->bhqk", q, k) / math.sqrt(head_size)
    scores = jnp.where(mask == 0, -1e9, scores)
    tri = jnp.tril(jnp.ones((S, S)))
    scores = jnp.where(tri == 0, -1e9, scores)
    p = jax.nn.softmax(scores, axis=-1)
    attn = jnp.einsum("bhqk,bhkd->bhqd", p, v).transpose(0, 2, 1, 3)
    attn = attn.reshape(B, S, F)
    attn = lin(attn, params["wf"], params["bf"])              # final_layer

    def layer_norm(a, w, b):
        mean = jnp.mean(a, axis=-1, keepdims=True)
        std = jnp.sqrt(jnp.sum((a - mean) ** 2, axis=-1, keepdims=True) / (D - 1))
        return w * (a - mean) / (std + eps) + b

    h1 = layer_norm(attn + x, params["ln1_w"], params["ln1_b"])
    f1 = jax.nn.relu(lin(h1, params["w_conv1"], params["b_conv1"]))
    f2 = lin(f1, params["w_conv2"], params["b_conv2"])
    return layer_norm(f2 + h1, params["ln2_w"], params["ln2_b"])


if __name__ == "__main__":
    B, S = 2, 8
    d_model = 32           # hidden
    num_heads = 4          # attn_heads
    head_size = 8
    d_ff = 64              # feed_forward_hidden
    F = num_heads * head_size

    root = jax.random.PRNGKey(0)
    ks = jax.random.split(root, 16)
    n = lambda i, shape: 0.1 * jax.random.normal(ks[i], shape, jnp.float32)

    # Parameters in native torch layouts: Linear / Conv1d weights are (out, in).
    params = {
        "wq": n(0, (F, d_model)), "bq": n(1, (F,)),
        "wk": n(2, (F, d_model)), "bk": n(3, (F,)),
        "wv": n(4, (F, d_model)), "bv": n(5, (F,)),
        "wf": n(6, (d_model, F)), "bf": n(7, (d_model,)),         # final_layer
        "ln1_w": 1.0 + n(8, (d_model,)), "ln1_b": n(9, (d_model,)),
        "w_conv1": n(10, (d_ff, d_model)), "b_conv1": n(11, (d_ff,)),
        "w_conv2": n(12, (d_model, d_ff)), "b_conv2": n(13, (d_model,)),
        "ln2_w": 1.0 + n(14, (d_model,)), "ln2_b": n(15, (d_model,)),
    }

    x = jax.random.normal(jax.random.PRNGKey(1), (B, S, d_model), jnp.float32)
    # active_entries: batch 0 fully active, batch 1 has its last 2 steps padded.
    active = jnp.ones((B, S, 1), jnp.float32)
    active = active.at[1, S - 2:, 0].set(0.0)

    packed = pack_params(params, num_heads=num_heads, head_size=head_size,
                         d_model=d_model, d_ff=d_ff)

    out = transformer_encoder_block(x, active, packed, num_heads=num_heads,
                                    head_size=head_size, d_ff=d_ff)
    out = jax.block_until_ready(out)

    ref = _reference(x, active, params, num_heads=num_heads,
                     head_size=head_size)

    assert out.shape == (B, S, d_model)
    assert bool(jnp.all(jnp.isfinite(out)))
    # bf16 MXU operands (f32 accumulation) -> tolerance relaxed from 5e-4.
    err = float(jnp.max(jnp.abs(out - ref)))
    assert err < 2e-2, f"max abs err = {err}"
    print("KERNEL_OK")
</pallas_src>

<mosaic_0001>
module attributes {stable_mosaic.version = 11 : i64} {
  func.func @_encoder_block_kernel(%arg0: i32, %arg1: memref<1x8x32xf32, #tpu.memory_space<vmem>>, %arg2: memref<1x8x1xf32, #tpu.memory_space<vmem>>, %arg3: memref<1x1x8xf32, #tpu.memory_space<vmem>>, %arg4: memref<160x128xbf16, #tpu.memory_space<vmem>>, %arg5: memref<8x128xf32, #tpu.memory_space<vmem>>, %arg6: memref<1x8x32xf32, #tpu.memory_space<vmem>>) attributes {dimension_semantics = [#tpu.dimension_semantics<parallel>], iteration_bounds = array<i64: 2>, scalar_prefetch = 0 : i64, scratch_operands = 0 : i64, tpu.core_type = #tpu.core_type<tc>, window_params = [{transform_indices = @transform_0, window_bounds = array<i64: 1, 8, 32>}, {transform_indices = @transform_1, window_bounds = array<i64: 1, 8, 1>}, {transform_indices = @transform_2, window_bounds = array<i64: 1, 1, 8>}, {pipeline_mode = #tpu.pipeline_mode<synchronous>, transform_indices = @transform_3, window_bounds = array<i64: 160, 128>}, {pipeline_mode = #tpu.pipeline_mode<synchronous>, transform_indices = @transform_4, window_bounds = array<i64: 8, 128>}, {transform_indices = @transform_5, window_bounds = array<i64: 1, 8, 32>}]} {
    %c0 = arith.constant 0 : index
    %c0_0 = arith.constant 0 : index
    %c0_1 = arith.constant 0 : index
    %0 = vector.load %arg1[%c0, %c0_0, %c0_1] : memref<1x8x32xf32, #tpu.memory_space<vmem>>, vector<1x8x32xf32>
    %1 = vector.shape_cast %0 : vector<1x8x32xf32> to vector<8x32xf32>
    %2 = arith.truncf %1 : vector<8x32xf32> to vector<8x32xbf16>
    %c0_2 = arith.constant 0 : index
    %c0_3 = arith.constant 0 : index
    %3 = vector.load %arg4[%c0_2, %c0_3] : memref<160x128xbf16, #tpu.memory_space<vmem>>, vector<32x96xbf16>
    %c32 = arith.constant 32 : index
    %c0_4 = arith.constant 0 : index
    %4 = vector.load %arg4[%c32, %c0_4] : memref<160x128xbf16, #tpu.memory_space<vmem>>, vector<32x32xbf16>
    %c64 = arith.constant 64 : index
    %c0_5 = arith.constant 0 : index
    %5 = vector.load %arg4[%c64, %c0_5] : memref<160x128xbf16, #tpu.memory_space<vmem>>, vector<32x64xbf16>
    %c96 = arith.constant 96 : index
    %c0_6 = arith.constant 0 : index
    %6 = vector.load %arg4[%c96, %c0_6] : memref<160x128xbf16, #tpu.memory_space<vmem>>, vector<64x32xbf16>
    %c0_7 = arith.constant 0 : index
    %c0_8 = arith.constant 0 : index
    %7 = vector.load %arg5[%c0_7, %c0_8] : memref<8x128xf32, #tpu.memory_space<vmem>>, vector<8x128xf32>
    %cst = arith.constant dense<0.000000e+00> : vector<8x96xf32>
    %8 = tpu.matmul %2, %3, %cst {dimension_numbers = #tpu.dot_dimension_numbers<[1], [0], [0], [1], [0, 0, 1, 1], [], []>} : vector<8x32xbf16>, vector<32x96xbf16>, vector<8x96xf32> -> vector<8x96xf32>
    %9 = vector.extract_strided_slice %7 {offsets = [0, 0], sizes = [1, 96], strides = [1, 1]} : vector<8x128xf32> to vector<1x96xf32>
    %10 = vector.broadcast %9 : vector<1x96xf32> to vector<8x96xf32>
    %11 = arith.addf %8, %10 : vector<8x96xf32>
    %c0_9 = arith.constant 0 : index
    %c0_10 = arith.constant 0 : index
    %c0_11 = arith.constant 0 : index
    %12 = vector.load %arg2[%c0_9, %c0_10, %c0_11] : memref<1x8x1xf32, #tpu.memory_space<vmem>>, vector<1x8x1xf32>
    %13 = vector.shape_cast %12 : vector<1x8x1xf32> to vector<8x1xf32>
    %c0_12 = arith.constant 0 : index
    %c0_13 = arith.constant 0 : index
    %c0_14 = arith.constant 0 : index
    %14 = vector.load %arg3[%c0_12, %c0_13, %c0_14] : memref<1x1x8xf32, #tpu.memory_space<vmem>>, vector<1x1x8xf32>
    %15 = vector.shape_cast %14 : vector<1x1x8xf32> to vector<1x8xf32>
    %16 = tpu.iota {dimensions = array<i32: 0>} : vector<8x8xi32>
    %17 = tpu.iota {dimensions = array<i32: 1>} : vector<8x8xi32>
    %cst_15 = arith.constant 5.000000e-01 : f32
    %18 = vector.broadcast %cst_15 : f32 to vector<8x1xf32>
    %19 = arith.cmpf ogt, %13, %18 : vector<8x1xf32>
    %cst_16 = arith.constant 5.000000e-01 : f32
    %20 = vector.broadcast %cst_16 : f32 to vector<1x8xf32>
    %21 = arith.cmpf ogt, %15, %20 : vector<1x8xf32>
    %22 = vector.broadcast %19 : vector<8x1xi1> to vector<8x8xi1>
    %23 = vector.broadcast %21 : vector<1x8xi1> to vector<8x8xi1>
    %24 = arith.andi %22, %23 : vector<8x8xi1>
    %25 = arith.cmpi sge, %16, %17 : vector<8x8xi32>
    %26 = arith.andi %24, %25 : vector<8x8xi1>
    %27 = vector.extract_strided_slice %11 {offsets = [0, 0], sizes = [8, 8], strides = [1, 1]} : vector<8x96xf32> to vector<8x8xf32>
    %28 = arith.truncf %27 : vector<8x8xf32> to vector<8x8xbf16>
    %29 = vector.extract_strided_slice %11 {offsets = [0, 32], sizes = [8, 8], strides = [1, 1]} : vector<8x96xf32> to vector<8x8xf32>
    %30 = arith.truncf %29 : vector<8x8xf32> to vector<8x8xbf16>
    %31 = vector.extract_strided_slice %11 {offsets = [0, 64], sizes = [8, 8], strides = [1, 1]} : vector<8x96xf32> to vector<8x8xf32>
    %32 = arith.truncf %31 : vector<8x8xf32> to vector<8x8xbf16>
    %cst_17 = arith.constant dense<0.000000e+00> : vector<8x8xf32>
    %33 = tpu.matmul %28, %30, %cst_17 {dimension_numbers = #tpu.dot_dimension_numbers<[1], [1], [0], [0], [0, 0, 1, 0], [], []>} : vector<8x8xbf16>, vector<8x8xbf16>, vector<8x8xf32> -> vector<8x8xf32>
    %cst_18 = arith.constant 0.353553385 : f32
    %34 = vector.broadcast %cst_18 : f32 to vector<8x8xf32>
    %35 = arith.mulf %33, %34 : vector<8x8xf32>
    %cst_19 = arith.constant -1.000000e+09 : f32
    %36 = vector.broadcast %cst_19 : f32 to vector<8x8xf32>
    %37 = arith.select %26, %35, %36 : vector<8x8xi1>, vector<8x8xf32>
    %cst_20 = arith.constant dense<0xFF800000> : vector<8xf32>
    %38 = vector.multi_reduction <maximumf>, %37, %cst_20 [1] : vector<8x8xf32> to vector<8xf32>
    %39 = vector.shape_cast %38 : vector<8xf32> to vector<8x1xf32>
    %40 = vector.broadcast %39 : vector<8x1xf32> to vector<8x8xf32>
    %41 = arith.subf %37, %40 : vector<8x8xf32>
    %42 = math.exp %41 : vector<8x8xf32>
    %cst_21 = arith.constant dense<0.000000e+00> : vector<8xf32>
    %43 = vector.multi_reduction <add>, %42, %cst_21 [1] : vector<8x8xf32> to vector<8xf32>
    %44 = vector.shape_cast %43 : vector<8xf32> to vector<8x1xf32>
    %45 = tpu.reciprocal %44 {approx = true} : vector<8x1xf32> -> vector<8x1xf32>
    %46 = vector.broadcast %45 : vector<8x1xf32> to vector<8x8xf32>
    %47 = arith.mulf %42, %46 : vector<8x8xf32>
    %48 = arith.truncf %47 : vector<8x8xf32> to vector<8x8xbf16>
    %cst_22 = arith.constant dense<0.000000e+00> : vector<8x8xf32>
    %49 = tpu.matmul %48, %32, %cst_22 {dimension_numbers = #tpu.dot_dimension_numbers<[1], [0], [0], [1], [0, 0, 1, 1], [], []>} : vector<8x8xbf16>, vector<8x8xbf16>, vector<8x8xf32> -> vector<8x8xf32>
    %50 = vector.extract_strided_slice %11 {offsets = [0, 8], sizes = [8, 8], strides = [1, 1]} : vector<8x96xf32> to vector<8x8xf32>
    %51 = arith.truncf %50 : vector<8x8xf32> to vector<8x8xbf16>
    %52 = vector.extract_strided_slice %11 {offsets = [0, 40], sizes = [8, 8], strides = [1, 1]} : vector<8x96xf32> to vector<8x8xf32>
    %53 = arith.truncf %52 : vector<8x8xf32> to vector<8x8xbf16>
    %54 = vector.extract_strided_slice %11 {offsets = [0, 72], sizes = [8, 8], strides = [1, 1]} : vector<8x96xf32> to vector<8x8xf32>
    %55 = arith.truncf %54 : vector<8x8xf32> to vector<8x8xbf16>
    %cst_23 = arith.constant dense<0.000000e+00> : vector<8x8xf32>
    %56 = tpu.matmul %51, %53, %cst_23 {dimension_numbers = #tpu.dot_dimension_numbers<[1], [1], [0], [0], [0, 0, 1, 0], [], []>} : vector<8x8xbf16>, vector<8x8xbf16>, vector<8x8xf32> -> vector<8x8xf32>
    %cst_24 = arith.constant 0.353553385 : f32
    %57 = vector.broadcast %cst_24 : f32 to vector<8x8xf32>
    %58 = arith.mulf %56, %57 : vector<8x8xf32>
    %cst_25 = arith.constant -1.000000e+09 : f32
    %59 = vector.broadcast %cst_25 : f32 to vector<8x8xf32>
    %60 = arith.select %26, %58, %59 : vector<8x8xi1>, vector<8x8xf32>
    %cst_26 = arith.constant dense<0xFF800000> : vector<8xf32>
    %61 = vector.multi_reduction <maximumf>, %60, %cst_26 [1] : vector<8x8xf32> to vector<8xf32>
    %62 = vector.shape_cast %61 : vector<8xf32> to vector<8x1xf32>
    %63 = vector.broadcast %62 : vector<8x1xf32> to vector<8x8xf32>
    %64 = arith.subf %60, %63 : vector<8x8xf32>
    %65 = math.exp %64 : vector<8x8xf32>
    %cst_27 = arith.constant dense<0.000000e+00> : vector<8xf32>
    %66 = vector.multi_reduction <add>, %65, %cst_27 [1] : vector<8x8xf32> to vector<8xf32>
    %67 = vector.shape_cast %66 : vector<8xf32> to vector<8x1xf32>
    %68 = tpu.reciprocal %67 {approx = true} : vector<8x1xf32> -> vector<8x1xf32>
    %69 = vector.broadcast %68 : vector<8x1xf32> to vector<8x8xf32>
    %70 = arith.mulf %65, %69 : vector<8x8xf32>
    %71 = arith.truncf %70 : vector<8x8xf32> to vector<8x8xbf16>
    %cst_28 = arith.constant dense<0.000000e+00> : vector<8x8xf32>
    %72 = tpu.matmul %71, %55, %cst_28 {dimension_numbers = #tpu.dot_dimension_numbers<[1], [0], [0], [1], [0, 0, 1, 1], [], []>} : vector<8x8xbf16>, vector<8x8xbf16>, vector<8x8xf32> -> vector<8x8xf32>
    %73 = vector.extract_strided_slice %11 {offsets = [0, 16], sizes = [8, 8], strides = [1, 1]} : vector<8x96xf32> to vector<8x8xf32>
    %74 = arith.truncf %73 : vector<8x8xf32> to vector<8x8xbf16>
    %75 = vector.extract_strided_slice %11 {offsets = [0, 48], sizes = [8, 8], strides = [1, 1]} : vector<8x96xf32> to vector<8x8xf32>
    %76 = arith.truncf %75 : vector<8x8xf32> to vector<8x8xbf16>
    %77 = vector.extract_strided_slice %11 {offsets = [0, 80], sizes = [8, 8], strides = [1, 1]} : vector<8x96xf32> to vector<8x8xf32>
    %78 = arith.truncf %77 : vector<8x8xf32> to vector<8x8xbf16>
    %cst_29 = arith.constant dense<0.000000e+00> : vector<8x8xf32>
    %79 = tpu.matmul %74, %76, %cst_29 {dimension_numbers = #tpu.dot_dimension_numbers<[1], [1], [0], [0], [0, 0, 1, 0], [], []>} : vector<8x8xbf16>, vector<8x8xbf16>, vector<8x8xf32> -> vector<8x8xf32>
    %cst_30 = arith.constant 0.353553385 : f32
    %80 = vector.broadcast %cst_30 : f32 to vector<8x8xf32>
    %81 = arith.mulf %79, %80 : vector<8x8xf32>
    %cst_31 = arith.constant -1.000000e+09 : f32
    %82 = vector.broadcast %cst_31 : f32 to vector<8x8xf32>
    %83 = arith.select %26, %81, %82 : vector<8x8xi1>, vector<8x8xf32>
    %cst_32 = arith.constant dense<0xFF800000> : vector<8xf32>
    %84 = vector.multi_reduction <maximumf>, %83, %cst_32 [1] : vector<8x8xf32> to vector<8xf32>
    %85 = vector.shape_cast %84 : vector<8xf32> to vector<8x1xf32>
    %86 = vector.broadcast %85 : vector<8x1xf32> to vector<8x8xf32>
    %87 = arith.subf %83, %86 : vector<8x8xf32>
    %88 = math.exp %87 : vector<8x8xf32>
    %cst_33 = arith.constant dense<0.000000e+00> : vector<8xf32>
    %89 = vector.multi_reduction <add>, %88, %cst_33 [1] : vector<8x8xf32> to vector<8xf32>
    %90 = vector.shape_cast %89 : vector<8xf32> to vector<8x1xf32>
    %91 = tpu.reciprocal %90 {approx = true} : vector<8x1xf32> -> vector<8x1xf32>
    %92 = vector.broadcast %91 : vector<8x1xf32> to vector<8x8xf32>
    %93 = arith.mulf %88, %92 : vector<8x8xf32>
    %94 = arith.truncf %93 : vector<8x8xf32> to vector<8x8xbf16>
    %cst_34 = arith.constant dense<0.000000e+00> : vector<8x8xf32>
    %95 = tpu.matmul %94, %78, %cst_34 {dimension_numbers = #tpu.dot_dimension_numbers<[1], [0], [0], [1], [0, 0, 1, 1], [], []>} : vector<8x8xbf16>, vector<8x8xbf16>, vector<8x8xf32> -> vector<8x8xf32>
    %96 = vector.extract_strided_slice %11 {offsets = [0, 24], sizes = [8, 8], strides = [1, 1]} : vector<8x96xf32> to vector<8x8xf32>
    %97 = arith.truncf %96 : vector<8x8xf32> to vector<8x8xbf16>
    %98 = vector.extract_strided_slice %11 {offsets = [0, 56], sizes = [8, 8], strides = [1, 1]} : vector<8x96xf32> to vector<8x8xf32>
    %99 = arith.truncf %98 : vector<8x8xf32> to vector<8x8xbf16>
    %100 = vector.extract_strided_slice %11 {offsets = [0, 88], sizes = [8, 8], strides = [1, 1]} : vector<8x96xf32> to vector<8x8xf32>
    %101 = arith.truncf %100 : vector<8x8xf32> to vector<8x8xbf16>
    %cst_35 = arith.constant dense<0.000000e+00> : vector<8x8xf32>
    %102 = tpu.matmul %97, %99, %cst_35 {dimension_numbers = #tpu.dot_dimension_numbers<[1], [1], [0], [0], [0, 0, 1, 0], [], []>} : vector<8x8xbf16>, vector<8x8xbf16>, vector<8x8xf32> -> vector<8x8xf32>
    %cst_36 = arith.constant 0.353553385 : f32
    %103 = vector.broadcast %cst_36 : f32 to vector<8x8xf32>
    %104 = arith.mulf %102, %103 : vector<8x8xf32>
    %cst_37 = arith.constant -1.000000e+09 : f32
    %105 = vector.broadcast %cst_37 : f32 to vector<8x8xf32>
    %106 = arith.select %26, %104, %105 : vector<8x8xi1>, vector<8x8xf32>
    %cst_38 = arith.constant dense<0xFF800000> : vector<8xf32>
    %107 = vector.multi_reduction <maximumf>, %106, %cst_38 [1] : vector<8x8xf32> to vector<8xf32>
    %108 = vector.shape_cast %107 : vector<8xf32> to vector<8x1xf32>
    %109 = vector.broadcast %108 : vector<8x1xf32> to vector<8x8xf32>
    %110 = arith.subf %106, %109 : vector<8x8xf32>
    %111 = math.exp %110 : vector<8x8xf32>
    %cst_39 = arith.constant dense<0.000000e+00> : vector<8xf32>
    %112 = vector.multi_reduction <add>, %111, %cst_39 [1] : vector<8x8xf32> to vector<8xf32>
    %113 = vector.shape_cast %112 : vector<8xf32> to vector<8x1xf32>
    %114 = tpu.reciprocal %113 {approx = true} : vector<8x1xf32> -> vector<8x1xf32>
    %115 = vector.broadcast %114 : vector<8x1xf32> to vector<8x8xf32>
    %116 = arith.mulf %111, %115 : vector<8x8xf32>
    %117 = arith.truncf %116 : vector<8x8xf32> to vector<8x8xbf16>
    %cst_40 = arith.constant dense<0.000000e+00> : vector<8x8xf32>
    %118 = tpu.matmul %117, %101, %cst_40 {dimension_numbers = #tpu.dot_dimension_numbers<[1], [0], [0], [1], [0, 0, 1, 1], [], []>} : vector<8x8xbf16>, vector<8x8xbf16>, vector<8x8xf32> -> vector<8x8xf32>
    %119 = tpu.concatenate %49, %72, %95, %118 in 1 : vector<8x8xf32>, vector<8x8xf32>, vector<8x8xf32>, vector<8x8xf32> -> vector<8x32xf32>
    %120 = arith.truncf %119 : vector<8x32xf32> to vector<8x32xbf16>
    %cst_41 = arith.constant dense<0.000000e+00> : vector<8x32xf32>
    %121 = tpu.matmul %120, %4, %cst_41 {dimension_numbers = #tpu.dot_dimension_numbers<[1], [0], [0], [1], [0, 0, 1, 1], [], []>} : vector<8x32xbf16>, vector<32x32xbf16>, vector<8x32xf32> -> vector<8x32xf32>
    %122 = vector.extract_strided_slice %7 {offsets = [1, 0], sizes = [1, 32], strides = [1, 1]} : vector<8x128xf32> to vector<1x32xf32>
    %123 = vector.broadcast %122 : vector<1x32xf32> to vector<8x32xf32>
    %124 = arith.addf %121, %123 : vector<8x32xf32>
    %125 = arith.addf %124, %1 : vector<8x32xf32>
    %126 = vector.extract_strided_slice %7 {offsets = [2, 0], sizes = [1, 32], strides = [1, 1]} : vector<8x128xf32> to vector<1x32xf32>
    %127 = vector.extract_strided_slice %7 {offsets = [3, 0], sizes = [1, 32], strides = [1, 1]} : vector<8x128xf32> to vector<1x32xf32>
    %cst_42 = arith.constant dense<0.000000e+00> : vector<8xf32>
    %128 = vector.multi_reduction <add>, %125, %cst_42 [1] : vector<8x32xf32> to vector<8xf32>
    %129 = vector.shape_cast %128 : vector<8xf32> to vector<8x1xf32>
    %cst_43 = arith.constant 3.125000e-02 : f32
    %130 = vector.broadcast %cst_43 : f32 to vector<8x1xf32>
    %131 = arith.mulf %129, %130 : vector<8x1xf32>
    %132 = vector.broadcast %131 : vector<8x1xf32> to vector<8x32xf32>
    %133 = arith.subf %125, %132 : vector<8x32xf32>
    %134 = arith.mulf %133, %133 : vector<8x32xf32>
    %cst_44 = arith.constant dense<0.000000e+00> : vector<8xf32>
    %135 = vector.multi_reduction <add>, %134, %cst_44 [1] : vector<8x32xf32> to vector<8xf32>
    %136 = vector.shape_cast %135 : vector<8xf32> to vector<8x1xf32>
    %cst_45 = arith.constant 0.0322580636 : f32
    %137 = vector.broadcast %cst_45 : f32 to vector<8x1xf32>
    %138 = arith.mulf %136, %137 : vector<8x1xf32>
    %139 = math.sqrt %138 : vector<8x1xf32>
    %140 = vector.broadcast %126 : vector<1x32xf32> to vector<8x32xf32>
    %141 = arith.mulf %140, %133 : vector<8x32xf32>
    %cst_46 = arith.constant 9.99999997E-7 : f32
    %142 = vector.broadcast %cst_46 : f32 to vector<8x1xf32>
    %143 = arith.addf %139, %142 : vector<8x1xf32>
    %144 = tpu.reciprocal %143 : vector<8x1xf32> -> vector<8x1xf32>
    %145 = vector.broadcast %144 : vector<8x1xf32> to vector<8x32xf32>
    %146 = arith.mulf %141, %145 : vector<8x32xf32>
    %147 = vector.broadcast %127 : vector<1x32xf32> to vector<8x32xf32>
    %148 = arith.addf %146, %147 : vector<8x32xf32>
    %149 = arith.truncf %148 : vector<8x32xf32> to vector<8x32xbf16>
    %cst_47 = arith.constant dense<0.000000e+00> : vector<8x64xf32>
    %150 = tpu.matmul %149, %5, %cst_47 {dimension_numbers = #tpu.dot_dimension_numbers<[1], [0], [0], [1], [0, 0, 1, 1], [], []>} : vector<8x32xbf16>, vector<32x64xbf16>, vector<8x64xf32> -> vector<8x64xf32>
    %151 = vector.extract_strided_slice %7 {offsets = [4, 0], sizes = [1, 64], strides = [1, 1]} : vector<8x128xf32> to vector<1x64xf32>
    %152 = vector.broadcast %151 : vector<1x64xf32> to vector<8x64xf32>
    %153 = arith.addf %150, %152 : vector<8x64xf32>
    %cst_48 = arith.constant 0.000000e+00 : f32
    %154 = vector.broadcast %cst_48 : f32 to vector<8x64xf32>
    %155 = arith.maximumf %153, %154 : vector<8x64xf32>
    %156 = arith.truncf %155 : vector<8x64xf32> to vector<8x64xbf16>
    %cst_49 = arith.constant dense<0.000000e+00> : vector<8x32xf32>
    %157 = tpu.matmul %156, %6, %cst_49 {dimension_numbers = #tpu.dot_dimension_numbers<[1], [0], [0], [1], [0, 0, 1, 1], [], []>} : vector<8x64xbf16>, vector<64x32xbf16>, vector<8x32xf32> -> vector<8x32xf32>
    %158 = vector.extract_strided_slice %7 {offsets = [5, 0], sizes = [1, 32], strides = [1, 1]} : vector<8x128xf32> to vector<1x32xf32>
    %159 = vector.broadcast %158 : vector<1x32xf32> to vector<8x32xf32>
    %160 = arith.addf %157, %159 : vector<8x32xf32>
    %161 = arith.addf %160, %148 : vector<8x32xf32>
    %162 = vector.extract_strided_slice %7 {offsets = [6, 0], sizes = [1, 32], strides = [1, 1]} : vector<8x128xf32> to vector<1x32xf32>
    %163 = vector.extract_strided_slice %7 {offsets = [7, 0], sizes = [1, 32], strides = [1, 1]} : vector<8x128xf32> to vector<1x32xf32>
    %cst_50 = arith.constant dense<0.000000e+00> : vector<8xf32>
    %164 = vector.multi_reduction <add>, %161, %cst_50 [1] : vector<8x32xf32> to vector<8xf32>
    %165 = vector.shape_cast %164 : vector<8xf32> to vector<8x1xf32>
    %cst_51 = arith.constant 3.125000e-02 : f32
    %166 = vector.broadcast %cst_51 : f32 to vector<8x1xf32>
    %167 = arith.mulf %165, %166 : vector<8x1xf32>
    %168 = vector.broadcast %167 : vector<8x1xf32> to vector<8x32xf32>
    %169 = arith.subf %161, %168 : vector<8x32xf32>
    %170 = arith.mulf %169, %169 : vector<8x32xf32>
    %cst_52 = arith.constant dense<0.000000e+00> : vector<8xf32>
    %171 = vector.multi_reduction <add>, %170, %cst_52 [1] : vector<8x32xf32> to vector<8xf32>
    %172 = vector.shape_cast %171 : vector<8xf32> to vector<8x1xf32>
    %cst_53 = arith.constant 0.0322580636 : f32
    %173 = vector.broadcast %cst_53 : f32 to vector<8x1xf32>
    %174 = arith.mulf %172, %173 : vector<8x1xf32>
    %175 = math.sqrt %174 : vector<8x1xf32>
    %176 = vector.broadcast %162 : vector<1x32xf32> to vector<8x32xf32>
    %177 = arith.mulf %176, %169 : vector<8x32xf32>
    %cst_54 = arith.constant 9.99999997E-7 : f32
    %178 = vector.broadcast %cst_54 : f32 to vector<8x1xf32>
    %179 = arith.addf %175, %178 : vector<8x1xf32>
    %180 = tpu.reciprocal %179 : vector<8x1xf32> -> vector<8x1xf32>
    %181 = vector.broadcast %180 : vector<8x1xf32> to vector<8x32xf32>
    %182 = arith.mulf %177, %181 : vector<8x32xf32>
    %183 = vector.broadcast %163 : vector<1x32xf32> to vector<8x32xf32>
    %184 = arith.addf %182, %183 : vector<8x32xf32>
    %c0_55 = arith.constant 0 : index
    %c0_56 = arith.constant 0 : index
    %c0_57 = arith.constant 0 : index
    %185 = vector.load %arg6[%c0_55, %c0_56, %c0_57] : memref<1x8x32xf32, #tpu.memory_space<vmem>>, vector<1x8x32xf32>
    %186 = vector.shape_cast %185 : vector<1x8x32xf32> to vector<8x32xf32>
    %187 = vector.shape_cast %184 : vector<8x32xf32> to vector<1x8x32xf32>
    tpu.vector_store %arg6[%c0_55, %c0_56, %c0_57], %187 {strides = array<i32>} : memref<1x8x32xf32, #tpu.memory_space<vmem>>, vector<1x8x32xf32>,
    return
  }
  func.func @transform_0(%arg0: i32) -> (i32, i32, i32) {
    %c0_i32 = arith.constant 0 : i32
    %c0_i32_0 = arith.constant 0 : i32
    %c0_i32_1 = arith.constant 0 : i32
    return %arg0, %c0_i32, %c0_i32_0 : i32, i32, i32
  }
  func.func @transform_1(%arg0: i32) -> (i32, i32, i32) {
    %c0_i32 = arith.constant 0 : i32
    %c0_i32_0 = arith.constant 0 : i32
    %c0_i32_1 = arith.constant 0 : i32
    return %arg0, %c0_i32, %c0_i32_0 : i32, i32, i32
  }
  func.func @transform_2(%arg0: i32) -> (i32, i32, i32) {
    %c0_i32 = arith.constant 0 : i32
    %c0_i32_0 = arith.constant 0 : i32
    %c0_i32_1 = arith.constant 0 : i32
    return %arg0, %c0_i32, %c0_i32_0 : i32, i32, i32
  }
  func.func @transform_3(%arg0: i32) -> (i32, i32) {
    %c0_i32 = arith.constant 0 : i32
    %c0_i32_0 = arith.constant 0 : i32
    %c0_i32_1 = arith.constant 0 : i32
    return %c0_i32, %c0_i32_0 : i32, i32
  }
  func.func @transform_4(%arg0: i32) -> (i32, i32) {
    %c0_i32 = arith.constant 0 : i32
    %c0_i32_0 = arith.constant 0 : i32
    %c0_i32_1 = arith.constant 0 : i32
    return %c0_i32, %c0_i32_0 : i32, i32
  }
  func.func @transform_5(%arg0: i32) -> (i32, i32, i32) {
    %c0_i32 = arith.constant 0 : i32
    %c0_i32_0 = arith.constant 0 : i32
    %c0_i32_1 = arith.constant 0 : i32
    return %arg0, %c0_i32, %c0_i32_0 : i32, i32, i32
  }
}

</mosaic_0001>

<bundles_post_ra>
// kernel: tpu_custom_call.1
= control target key start
LH: loop header
LB: loop body
LE: loop exit
PB: predicated region body
PF: predicated region fallthrough
CT: control target
= control target key end

     0   :  { %10 = vsyncpa [#allocation3], 0  ;;  %s2021_s0 = inlined_call_operand.vmem [shape: f32[2,8,32], index: 0, kind: input, shape index: {}]   ;;  %s2022_s1 = inlined_call_operand.vmem [shape: f32[2,8,1], index: 1, kind: input, shape index: {}]   ;;  %s2023_s2 = inlined_call_operand.hbm [shape: f32[2,1,8], index: 2, kind: input, shape index: {}]   ;;  %s2024_s3 = inlined_call_operand.hbm [shape: bf16[160,128], index: 3, kind: input, shape index: {}]   ;;  %s2025_s4 = inlined_call_operand.vmem [shape: f32[8,128], index: 4, kind: input, shape index: {}]   ;;  %s2026_s5 = inlined_call_operand.hbm [shape: f32[2,8,32], index: 5, kind: output, shape index: {}]  }
   0x1   :  { %12 = vsyncpa [#allocation3 + $0x1], 0 }
   0x2   :  { %13 = vsyncpa [#allocation6], 0 }
   0x3   :  { %14 = vsyncpa [#allocation4], 0 }
   0x4   :  { %16 = vsyncpa [#allocation4 + $0x1], 0  ;;  %s1675_s18 = smov 0   ;;  %s1677_s19 = smov 0  }
   0x5   :  { %s1679_s20 = smov 0   ;;  %s1681_s21 = smov 0  }
   0x6 LB: > { %s1696_s22 = sadd.s32 4294967295, %s1621_s21   ;;  %s1231_s23 = sadd.s32 4294967294, %s1621_s21   ;;  %s1621_s21 = sphi %s1681_s21, %s2048_s21   ;;  %s1617_s20 = sphi %s1679_s20, %s2047_s20   ;;  %s1613_s19 = sphi %s1677_s19, %s2046_s19   ;;  %s1609_s18 = sphi %s1675_s18, %s2045_s18  }
   0x7   : > { %p94_p0 = scmp.ne.s32.totalorder %s1613_s19, %s1609_s18  ;;  %p2027_p1 = scmp.eq.s32.totalorder %s1696_s22, 0 }
   0x8   : > { %p166_p3 = scmp.eq.s32.totalorder %s1231_s23, 1  ;;  %p1232_p5 = scmp.ge.s32.totalorder %s1621_s21, 1 }
   0x9   : > { %p1705_p4 = por %p2027_p1, %p94_p0  ;;  %p173_p7 = scmp.lt.s32.totalorder %s1621_s21, 3 }
   0xa   : > { %p1710_p6 = por %p166_p3, %p94_p0  ;;  %s1623_s27 = smov [#allocation5]  }
   0xb   : > { %s2030_s24 = scalar_select %p1705_p4, 1, 0 }
   0xc   : > { %s2031_s25 = scalar_select %p1710_p6, 1, 0 }
   0xd   : > { %p1715_p8 = pnand %p1232_p5, %p173_p7  ;;  %s185_s28 = sshll.u32 %s1623_s27, 4  ;;  %s1719_s28 = int_to_ptr.vmem [resolvable:$true] %s185_s28 }
   0xe   : > { %s1731_s30 = sadd.s32 1, %s1621_s21   ;;  %s81_s6 = sadd.s32 1, %s1617_s20 }
   0xf   : > { %s2032_s26 = scalar_select %p1715_p8, 1, 0 }
  0x10   : > { %p1389_p9 = pneg %p1715_p8  ;;  %s78_s7 = ssub.s32 %s1621_s21, %s1731_s30 }
  0x11   : > { %s1493_s10 = scalar_lea.hbm %s2024_s3, 1280 }
  0x12   : > { %p1726_p11 = pnand %p1389_p9, %p2027_p1  ;;  %p1494_p12 = scmp.ne.s32.totalorder %s2024_s3, %s1493_s10 }
  0x13   : > { %p1500_p5 = scmp.lt.u32.totalorder %s1493_s10, %s2024_s3 }
  0x14   : > { %p1495_p13 = pneg %p1726_p11 }
  0x16   : > { %p1496_p0 = pnand %p1495_p13, %p1494_p12 }
  0x18   : > { %p1497_p3 = pneg %p1496_p0 }
  0x1a   : > { %p1502_p7 = pnand %p1500_p5, %p1497_p3 }
  0x1c   : > { %1505 = shalt.err (!%p1502_p7)
}
  0x1d   : > { %s1506_s15 = scalar_lea.vmem %s1719_s28, 1280  ;;  %p1514_p2 = scmp.lt.s32.totalorder %s1719_s28, %s1719_s28 }
  0x1e   : > { %p1507_p9 = scmp.ne.s32.totalorder %s1719_s28, %s1506_s15  ;;  %p1515_p6 = scmp.lt.s32.totalorder %s1506_s15, %s1506_s15 }
  0x20   : > { %p1509_p10 = pnand %p1507_p9, %p1495_p13  ;;  %p1516_p4 = por %p1515_p6, %p1514_p2 }
  0x22   : > { %p1510_p1 = pneg %p1509_p10 }
  0x24   : > { %p1517_p8 = pnand %p1516_p4, %p1510_p1 }
  0x26   : > { %1520 = shalt.err (!%p1517_p8)
}
  0x27   : > { %s1624_s16 = smov 64   ;;  %s1625_s17 = smov 4  }
  0x28   : > { %1392 = dma.hbm_to_vmem [thread:$0]  (!%p1726_p11), %s2024_s3, 1280, %s1719_s28, [#allocation6], %s1624_s16, %s1624_s16, %s1625_s17  }
  0x29   : > { %p79_p2 = scmp.eq.s32.totalorder %s78_s7, 0  ;;  %p88_p1 = scmp.ne.s32.totalorder %s1617_s20, %s1613_s19 }
  0x2a   : > { %p89_p4 = scmp.eq.s32.totalorder %s1621_s21, 0  ;;  %p1402_p6 = scmp.lt.s32.totalorder %s1621_s21, 2 }
  0x2b   : > { %s1762_s8 = scalar_select %p79_p2, %s1617_s20, %s81_s6  }
  0x2c   : > { %p90_p8 = por %p89_p4, %p88_p1  ;;  %p2034_p10 = scmp.eq.s32.totalorder %s1696_s22, 1 }
  0x2d   : > { %s216_s10 = sand.u32 1, %s1617_s20   ;;  %s1235_s11 = sshll.u32 %s1621_s21, 4 }
  0x2e   : > { %p1766_p12 = por %p2034_p10, %p88_p1  ;;  %s1775_s13 = scalar_lea.hbm %s2023_s2, %s1235_s11 }
  0x2f   : > { %s219_s28 = scalar_lea.vmem [#allocation2], %s216_s10  ;;  %p1779_p11 = pnand %p1402_p6, %p90_p8 }
  0x30   : > { %s226_s6 = sshll.u32 %s219_s28, 4  ;;  %s217_s14 = scalar_lea.sflag [#allocation3], %s216_s10  ;;  %s1777_s6 = int_to_ptr.vmem [resolvable:$true] %s226_s6 }
  0x31   : > { %s1521_s15 = scalar_lea.hbm %s1775_s13, 16  ;;  %p1523_p0 = pneg %p1779_p11 }
  0x32   : > { %p1522_p13 = scmp.ne.s32.totalorder %s1775_s13, %s1521_s15  ;;  %s1526_s23 = scalar_lea.hbm %s2023_s2, 32 }
  0x33   : > { %p1527_p7 = scmp.lt.u32.totalorder %s1775_s13, %s2023_s2  ;;  %p1528_p9 = scmp.lt.u32.totalorder %s1526_s23, %s1521_s15 }
  0x34   : > { %p1524_p3 = pnand %p1523_p0, %p1522_p13  ;;  %p1530_p1 = scmp.lt.u32.totalorder %s1521_s15, %s1775_s13 }
  0x35   : > { %p1529_p2 = por %p1528_p9, %p1527_p7 }
  0x36   : > { %p1525_p5 = pneg %p1524_p3 }
  0x37   : > { %p1531_p4 = por %p1530_p1, %p1529_p2 }
  0x39   : > { %p1532_p6 = pnand %p1531_p4, %p1525_p5 }
  0x3b   : > { %1535 = shalt.err (!%p1532_p6)
}
  0x3c   : > { %s1536_s10 = scalar_lea.vmem %s1777_s6, 16  ;;  %s1626_s12 = smov [#allocation2]  }
  0x3d   : > { %p1537_p8 = scmp.ne.s32.totalorder %s1777_s6, %s1536_s10  ;;  %s1541_s29 = sshll.u32 %s1626_s12, 4  ;;  %s1542_s29 = int_to_ptr.vmem [resolvable:$false] %s1541_s29 }
  0x3e   : > { %s1543_s28 = scalar_lea.vmem %s1542_s29, 32  ;;  %p1544_p3 = scmp.lt.s32.totalorder %s1777_s6, %s1542_s29 }
  0x3f   : > { %p1539_p10 = pnand %p1537_p8, %p1523_p0  ;;  %p1545_p7 = scmp.lt.s32.totalorder %s1543_s28, %s1536_s10 }
  0x41   : > { %p1540_p13 = pneg %p1539_p10  ;;  %p1546_p9 = por %p1545_p7, %p1544_p3 }
  0x43   : > { %p1547_p2 = pnand %p1546_p9, %p1540_p13 }
  0x45   : > { %1550 = shalt.err (!%p1547_p2)
}
  0x46   : > { %1396 = dma.hbm_to_vmem [thread:$0]  (!%p1779_p11), %s1775_s13, 16, %s1777_s6, %s217_s14  }
  0x47   : > { %p2037_p5 = scmp.ne.s32.totalorder %s2032_s26, 0 }
  0x48   : > { %s1811_s15 = sand.u32 (!%p2037_p5), 1, %s1613_s19   ;;  %p2038_p0 = scmp.ne.s32.totalorder (!%p2037_p5), %s2030_s24, 0 }
  0x49   : > { %235 = sbr.rel (%p2037_p5) target bundleno = 2673 (0xa71), region = 40  ;;  %s238_s16 = scalar_lea.sflag (!%p2037_p5), [#allocation3], %s1811_s15 }
  0x4a   : > { %s240_s17 = scalar_lea.vmem (!%p2037_p5), [#allocation2], %s1811_s15 }
  0x50   : > { %1596 = dma.done.wait (%p2038_p0), %s238_s16, 16  }
  0x51   : > { %1598 = vsyncadd (%p2038_p0), %s238_s16, 4294967280  ;;  %p2039_p1 = scmp.eq.s32.totalorder %s1696_s22, 0 }
  0x53   : > { %1600 = dma.done.wait (%p2039_p1), [#allocation6], 1280   ;;  %p2040_p11 = pmov %p2039_p1 }
  0x54   : > { %p278_p4 = scmp.lt.s32.totalorder %s1696_s22, 1  ;;  %v1627_v0 = vmov 0.0   ;;  %vm1628_vm0 = vmmov 0   ;;  %v1459_v1 = vld [vmem:[#allocation5] sm:$0xff]   ;;  %v1460_v2 = vld [vmem:[#allocation5 + $0x8] sm:$0xff]   ;;  %vm326_vm1 = vcmask 261120   ;;  %v310_v5 = vlaneseq }
  0x55   : > { %1602 = vsyncadd (%p2040_p11), [#allocation6], 4294966016  ;;  %1297 = vmatprep.subr.bf16.mxu0 %v1627_v0  ;;  %1301 = vmatprep.mubr.msk.bf16.mxu0 %vm1628_vm0, %v1627_v0  ;;  %v1855_v8 = vld [vmem:[%s2025_s4] sm:$0xff]  ;;  %s1629_s27 = smov 120   ;;  %s1630_s11 = smov 96   ;;  %v1636_v16 = vmov 0  }
  0x56   : > { %s1828_s26 = scalar_select %p278_p4, %s1696_s22, 1  ;;  %1305 = vmatprep.subr.bf16.mxu1 %v1627_v0  ;;  %1307 = vmatprep.mubr.msk.bf16.mxu1 %vm1628_vm0, %v1627_v0  ;;  %v1849_v6 = vshrl.u32 %v310_v5, 7  ;;  %vm396_vm3 = vcmask 64512   ;;  %v371_v30 = vld [vmem:[%s240_s17] sm:$0x1]  ;;  %v375_v34 = vand.u32 127, %v310_v5 }
  0x57   : > { %1298 = vmatpush3.bf16.msra.mxu0 %v1459_v1  ;;  %s1631_s10 = smov 80   ;;  %s1632_s12 = smov 88   ;;  %1457 = vset.pattern.permute.xlu1 %v1636_v16  ;;  %vm377_vm4 = vcmp.gt.f32.partialorder %v371_v30, 0.5  ;;  %vm462_vm10 = vcmask 1043456   ;;  %vm855_vm11 = vcmask 130048   ;;  %vm857_vm12 = vcmask 195584  }
  0x58   : > { %s1239_s24 = sshll.u32 %s1828_s26, 3  ;;  %1299 = vmatprep.subr.bf16.mxu0 %v1627_v0  ;;  %v312_v7 = vsub.s32 0, %v1849_v6  ;;  %s1633_s29 = smov 72   ;;  %1458 = vset.pattern.permute.xlu0 %v1636_v16  ;;  %v383_v31 = vsel %vm377_vm4, 1, %v1636_v16  ;;  %vm390_vm7 = vcmp.ge.s32.totalorder %v1849_v6, %v375_v34  ;;  %vm1040_vm15 = vcmask 523264  }
  0x59   : > { %s281_s7 = scalar_lea.vmem %s2021_s0, %s1239_s24  ;;  %s1634_s28 = smov 112  }
  0x5a   : > { %v1839_v3 = vld [vmem:[%s281_s7] sm:$0xff]  ;;  %v313_v9 = vrot.slane %v1855_v8, %v312_v7  ;;  %s1635_s16 = smov 104   ;;  %s285_s7 = scalar_lea.vmem %s2022_s1, %s1239_s24  ;;  %v387_v32 = vrot.slane %v383_v31, %v312_v7 }
  0x5b   : > { %v288_v4 = vpack.c.bf16 %v1839_v3, %v1839_v3  ;;  %1300 = vmatpush3.bf16.msra.mxu0 %v1460_v2  ;;  %v370_v17 = vld [vmem:[%s285_s7] sm:$0xff]  ;;  %s1637_s17 = smov 64   ;;  %s1638_s26 = smov 56  }
  0x5c   : > { %1311 = vmatprep.subr.bf16.mxu0 %v1627_v0  ;;  %vm376_vm2 = vcmp.gt.f32.partialorder %v370_v17, 0.5  ;;  %vm388_vm5 = vcmp.eq.s32.totalorder %v387_v32, 1  ;;  %s1639_s24 = smov 48   ;;  %s1640_s14 = smov 40  }
  0x5d   : > { %v378_v18 = vsel %vm376_vm2, 1, %v1636_v16  ;;  %s1641_s23 = smov 8   ;;  %s1117_s7 = scalar_lea.sflag [#allocation4], %s1811_s15 }
  0x5e   : > { %1302 = vmatmul.mubr.msk.bf16.vlgmr.msra.gmra.mrb[0].mxu0 %vm326_vm1, %v288_v4 }
  0x5f   : > { %1313 = vmatprep.mubr.msk.bf16.mxu0 %vm1628_vm0, %v1627_v0 }
 0x131   : > { %v364_v10 = vpop.f32.mrb[0].mxu0 }
 0x132   : > { %v365_v11 = vadd.f32 %v364_v10, %v313_v9  ;;  %v1303_v12 = vpop.f32.mrb[1].mxu0 }
 0x133   : > { %v367_v13 = vpop.f32.mrb[2].mxu0 }
 0x134   : > { %v1858_v14 = vpack.c.bf16 %v365_v11, %v365_v11  ;;  %v1304_v15 = vpop.f32.mrb[3].mxu0 }
 0x136   : > { %506 = vrot.lane.b32.xlu1 %v1858_v14, %s1629_s27  ;;  %394 = vrot.lane.b32.xlu0 %v1858_v14, %s1630_s11  ;;  %s1642_s27 = smov 16   ;;  %s1643_s11 = smov 24  }
 0x13a   : > { %620 = vrot.lane.b32.xlu1 %v1858_v14, %s1631_s10  ;;  %508 = vrot.lane.b32.xlu0 %v1858_v14, %s1632_s12  ;;  %s1238_s10 = sshll.u32 %s1811_s15, 3  ;;  %s1264_s12 = sshll.u32 %s1696_s22, 7 }
 0x13b   : > { %s1976_s6 = scalar_lea.hbm %s2026_s5, %s1264_s12  ;;  %s1644_s22 = smov [#allocation7]  }
 0x13e   : > { %732 = vrot.lane.b32.xlu1 %v1858_v14, %s1633_s29  ;;  %618 = vrot.lane.b32.xlu0 %v1858_v14, %s1634_s28  ;;  %s277_s29 = scalar_lea.vmem [#allocation7], %s1238_s10 }
 0x13f   : > { %s1130_s28 = sshll.u32 %s277_s29, 4  ;;  %s1978_s28 = int_to_ptr.vmem [resolvable:$true] %s1130_s28 }
 0x142   : > { %730 = vrot.lane.b32.xlu0 %v1858_v14, %s1635_s16  ;;  %380 = vperm.xlu1 %1457, %v378_v18  }
 0x1a8   : > { %v395_v19 = vpop.permute.xlu0 %394  ;;  %v507_v22 = vpop.permute.xlu1 %506 }
 0x1a9   : > { %v401_v20 = vsel %vm396_vm3, %v395_v19, 0 }
 0x1aa   : > { %1306 = vmatpush3.bf16.xpose.msra.mxu1 %v401_v20 }
 0x1ab   : > { %1317 = vmatprep.subr.bf16.mxu1 %v1627_v0 }
 0x1ac   : > { %v509_v21 = vpop.permute.xlu0 %508  ;;  %v621_v24 = vpop.permute.xlu1 %620 }
 0x1ad   : > { %v514_v23 = vsel %vm396_vm3, %v509_v21, 0  ;;  %v626_v25 = vsel %vm396_vm3, %v621_v24, 0 }
 0x1b0   : > { %v733_v26 = vpop.permute.xlu1 %732  ;;  %v619_v27 = vpop.permute.xlu0 %618 }
 0x1b1   : > { %1308 = vmatmul.mubr.msk.bf16.vlgmr.msra.gmra.mrb[0].mxu1 %vm396_vm3, %v1858_v14  ;;  %v738_v28 = vsel %vm396_vm3, %v733_v26, 0 }
 0x1b2   : > { %1318 = vmatpush3.bf16.xpose.msra.mxu1 %v514_v23  ;;  %1319 = vmatprep.mubr.msk.bf16.mxu1 %vm1628_vm0, %v1627_v0 }
 0x1b3   : > { %1329 = vmatprep.subr.bf16.mxu1 %v1627_v0 }
 0x1b4   : > { %v731_v29 = vpop.permute.xlu0 %730 }
 0x1b9   : > { %1320 = vmatmul.mubr.msk.bf16.vlgmr.msra.gmra.mrb[4].mxu1 %vm396_vm3, %v507_v22 }
 0x1ba   : > { %1330 = vmatpush3.bf16.xpose.msra.mxu1 %v626_v25  ;;  %1331 = vmatprep.mubr.msk.bf16.mxu1 %vm1628_vm0, %v1627_v0 }
 0x1bb   : > { %1341 = vmatprep.subr.bf16.mxu1 %v1627_v0 }
 0x1c1   : > { %1332 = vmatmul.mubr.msk.bf16.vlgmr.msra.gmra.mrb[8].mxu1 %vm396_vm3, %v619_v27  ;;  %v381_v33 = vpop.permute.xlu1 %380 }
 0x1c2   : > { %1342 = vmatpush3.bf16.xpose.msra.mxu1 %v738_v28  ;;  %1343 = vmatprep.mubr.msk.bf16.mxu1 %vm1628_vm0, %v1627_v0  ;;  %vm382_vm6 = vcmp.eq.s32.totalorder %v381_v33, 1 }
 0x1c3   : > { %1353 = vmatprep.subr.bf16.mxu1 %v1627_v0  ;;  %vm389_vm8 = vmand %vm382_vm6, %vm388_vm5 }
 0x1c4   : > { %vm1897_vm9 = vmand %vm389_vm8, %vm390_vm7 }
 0x1c9   : > { %1344 = vmatmul.mubr.msk.bf16.vlgmr.msra.gmra.mrb[12].mxu1 %vm396_vm3, %v731_v29 }
 0x1ca   : > { %1357 = vmatprep.mubr.msk.bf16.mxu1 %vm1628_vm0, %v1627_v0 }
 0x284   : > { %v437_v36 = vpop.f32.mrb[0].mxu1 }
 0x285   : > { %v443_v37 = vmul.f32 0.35355338, %v437_v36  ;;  %v1309_v38 = vpop.f32.mrb[1].mxu1 }
 0x286   : > { %v440_v39 = vpop.f32.mrb[2].mxu1 }
 0x287   : > { %v1310_v40 = vpop.f32.mrb[3].mxu1  ;;  %v444_v41 = vsel %vm1897_vm9, %v443_v37, -1e+09 }
 0x288   : > { %v445_v42 = vsel %vm396_vm3, %v444_v41, -inf }
 0x289   : > { %446 = vmax.xlane.f32.xlu0 %v445_v42 }
 0x28c   : > { %v550_v43 = vpop.f32.mrb[4].mxu1 }
 0x28d   : > { %v556_v44 = vmul.f32 0.35355338, %v550_v43  ;;  %v1321_v45 = vpop.f32.mrb[5].mxu1 }
 0x28e   : > { %v553_v46 = vpop.f32.mrb[6].mxu1 }
 0x28f   : > { %v1322_v47 = vpop.f32.mrb[7].mxu1  ;;  %v557_v48 = vsel %vm1897_vm9, %v556_v44, -1e+09 }
 0x290   : > { %v558_v49 = vsel %vm396_vm3, %v557_v48, -inf }
 0x291   : > { %559 = vmax.xlane.f32.xlu1 %v558_v49 }
 0x294   : > { %v662_v50 = vpop.f32.mrb[8].mxu1 }
 0x295   : > { %v668_v51 = vmul.f32 0.35355338, %v662_v50  ;;  %v1333_v52 = vpop.f32.mrb[9].mxu1 }
 0x296   : > { %v665_v53 = vpop.f32.mrb[10].mxu1 }
 0x297   : > { %v1334_v54 = vpop.f32.mrb[11].mxu1  ;;  %v669_v55 = vsel %vm1897_vm9, %v668_v51, -1e+09 }
 0x298   : > { %v670_v56 = vsel %vm396_vm3, %v669_v55, -inf }
 0x299   : > { %671 = vmax.xlane.f32.xlu0 %v670_v56  ;;  %v1461_v56 = vld [vmem:[#allocation5 + $0x10] sm:$0xff]  }
 0x29a   : > { %1354 = vmatpush3.bf16.msra.mxu1 %v1461_v56 }
 0x29b   : > { %1355 = vmatprep.subr.bf16.mxu1 %v1627_v0 }
 0x29c   : > { %v774_v57 = vpop.f32.mrb[12].mxu1 }
 0x29d   : > { %v780_v58 = vmul.f32 0.35355338, %v774_v57  ;;  %v1345_v59 = vpop.f32.mrb[13].mxu1  ;;  %v1462_v57 = vld [vmem:[#allocation5 + $0x18] sm:$0xff]  }
 0x29e   : > { %v777_v60 = vpop.f32.mrb[14].mxu1  ;;  %1356 = vmatpush3.bf16.msra.mxu1 %v1462_v57 }
 0x29f   : > { %v1346_v61 = vpop.f32.mrb[15].mxu1  ;;  %v781_v62 = vsel %vm1897_vm9, %v780_v58, -1e+09  ;;  %1369 = vmatprep.subr.bf16.mxu1 %v1627_v0 }
 0x2a0   : > { %v782_v63 = vsel %vm396_vm3, %v781_v62, -inf }
 0x2a1   : > { %783 = vmax.xlane.f32.xlu0 %v782_v63 }
 0x316   : > { %v447_v1 = vpop.xlane.xlu0 %446 }
 0x317   : > { %v448_v2 = vsub.f32 %v444_v41, %v447_v1 }
 0x319   : > { %v449_v4 = vmul.f32 1.442695, %v448_v2 }
 0x31b   : > { %1469 = vpow2.f32 %v449_v4 }
 0x31e   : > { %v560_v5 = vpop.xlane.xlu1 %559 }
 0x31f   : > { %v561_v7 = vsub.f32 %v557_v48, %v560_v5 }
 0x321   : > { %v562_v9 = vmul.f32 1.442695, %v561_v7 }
 0x323   : > { %1471 = vpow2.f32 %v562_v9 }
 0x325   : > { %v1470_v10 = vpop.eup %1469 }
 0x326   : > { %v451_v11 = vsel %vm396_vm3, %v1470_v10, 0.0  ;;  %v672_v12 = vpop.xlane.xlu0 %671 }
 0x327   : > { %452 = vadd.xlane.f32.xlu1 %v451_v11  ;;  %v673_v21 = vsub.f32 %v669_v55, %v672_v12 }
 0x329   : > { %v674_v22 = vmul.f32 1.442695, %v673_v21 }
 0x32d   : > { %v1472_v13 = vpop.eup %1471 }
 0x32e   : > { %v784_v15 = vpop.xlane.xlu0 %783  ;;  %v564_v16 = vsel %vm396_vm3, %v1472_v13, 0.0 }
 0x32f   : > { %v785_v17 = vsub.f32 %v781_v62, %v784_v15  ;;  %565 = vadd.xlane.f32.xlu0 %v564_v16 }
 0x331   : > { %v786_v18 = vmul.f32 1.442695, %v785_v17 }
 0x333   : > { %1473 = vpow2.f32 %v786_v18 }
 0x334   : > { %1475 = vpow2.f32 %v674_v22 }
 0x338   : > { %457 = vrot.lane.b32.xlu1 %v1858_v14, %s1637_s17  ;;  %s1551_s17 = scalar_lea.vmem %s1978_s28, 128 }
 0x339   : > { %p1552_p6 = scmp.ne.s32.totalorder %s1978_s28, %s1551_s17 }
 0x33b   : > { %p1553_p8 = pnand %p1552_p6, %p1766_p12 }
 0x33d   : > { %v1474_v19 = vpop.eup %1473  ;;  %p1554_p10 = pneg %p1553_p8 }
 0x33e   : > { %v788_v20 = vsel %vm396_vm3, %v1474_v19, 0.0  ;;  %v1476_v23 = vpop.eup %1475 }
 0x33f   : > { %789 = vadd.xlane.f32.xlu0 %v788_v20  ;;  %v676_v24 = vsel %vm396_vm3, %v1476_v23, 0.0 }
 0x355   : > { %570 = vrot.lane.b32.xlu0 %v1858_v14, %s1638_s26  ;;  %s1555_s26 = sshll.u32 %s1644_s22, 4  ;;  %s1556_s26 = int_to_ptr.vmem [resolvable:$false] %s1555_s26 }
 0x356   : > { %p1558_p13 = scmp.lt.s32.totalorder %s1978_s28, %s1556_s26 }
 0x35c   : > { %677 = vadd.xlane.f32.xlu1 %v676_v24 }
 0x36d   : > { %682 = vrot.lane.b32.xlu1 %v1858_v14, %s1639_s24  ;;  %s1557_s24 = scalar_lea.vmem %s1556_s26, 256 }
 0x36e   : > { %p1559_p3 = scmp.lt.s32.totalorder %s1557_s24, %s1551_s17 }
 0x370   : > { %p1560_p7 = por %p1559_p3, %p1558_p13 }
 0x371   : > { %794 = vrot.lane.b32.xlu1 %v1858_v14, %s1640_s14 }
 0x372   : > { %p1561_p9 = pnand %p1560_p7, %p1554_p10 }
 0x3b4   : > { %v453_v25 = vpop.xlane.xlu1 %452 }
 0x3b5   : > { %1477 = vrcp.f32 %v453_v25 }
 0x3b8   : > { %v458_v26 = vpop.permute.xlu1 %457 }
 0x3b9   : > { %v464_v27 = vsel %vm462_vm10, %v458_v26, 0 }
 0x3ba   : > { %1312 = vmatpush3.bf16.msra.mxu0 %v464_v27 }
 0x3bb   : > { %1323 = vmatprep.subr.bf16.mxu0 %v1627_v0 }
 0x3bc   : > { %v566_v29 = vpop.xlane.xlu0 %565 }
 0x3bd   : > { %1479 = vrcp.f32 %v566_v29  ;;  %v1464_v29 = vld [vmem:[#allocation5 + $0x28] sm:$0xff]  }
 0x3bf   : > { %v1478_v28 = vpop.eup %1477 }
 0x3c0   : > { %v455_v30 = vmul.f32 %v1478_v28, %v1470_v10  ;;  %v1463_v28 = vld [vmem:[#allocation5 + $0x20] sm:$0xff]  }
 0x3c2   : > { %v456_v31 = vpack.c.bf16 %v455_v30, %v455_v30  ;;  %v1465_v30 = vld [vmem:[#allocation5 + $0x30] sm:$0xff]  }
 0x3c4   : > { %1314 = vmatmul.mubr.msk.bf16.vlgmr.msra.gmra.mrb[4].mxu0 %vm396_vm3, %v456_v31  ;;  %v1466_v31 = vld [vmem:[#allocation5 + $0x38] sm:$0xff]  }
 0x3c5   : > { %1325 = vmatprep.mubr.msk.bf16.mxu0 %vm1628_vm0, %v1627_v0 }
 0x3c7   : > { %v1480_v14 = vpop.eup %1479 }
 0x3c8   : > { %v568_v33 = vmul.f32 %v1480_v14, %v1472_v13  ;;  %v862_v13 = vsub.s32 1, %v1849_v6 }
 0x3ca   : > { %v569_v36 = vpack.c.bf16 %v568_v33, %v568_v33  ;;  %v863_v15 = vrot.slane %v1855_v8, %v862_v13 }
 0x3cc   : > { %v790_v32 = vpop.xlane.xlu0 %789 }
 0x3d0   : > { %v571_v34 = vpop.permute.xlu0 %570 }
 0x3d1   : > { %v576_v35 = vsel %vm462_vm10, %v571_v34, 0 }
 0x3d2   : > { %1324 = vmatpush3.bf16.msra.mxu0 %v576_v35 }
 0x3d3   : > { %1335 = vmatprep.subr.bf16.mxu0 %v1627_v0 }
 0x3d5   : > { %1326 = vmatmul.mubr.msk.bf16.vlgmr.msra.gmra.mrb[8].mxu0 %vm396_vm3, %v569_v36 }
 0x3d6   : > { %1337 = vmatprep.mubr.msk.bf16.mxu0 %vm1628_vm0, %v1627_v0 }
 0x3e9   : > { %v678_v37 = vpop.xlane.xlu1 %677 }
 0x3ea   : > { %1481 = vrcp.f32 %v678_v37 }
 0x3eb   : > { %1483 = vrcp.f32 %v790_v32 }
 0x3ed   : > { %v683_v38 = vpop.permute.xlu1 %682 }
 0x3ee   : > { %v688_v39 = vsel %vm462_vm10, %v683_v38, 0  ;;  %v939_v38 = vsub.s32 2, %v1849_v6 }
 0x3ef   : > { %1336 = vmatpush3.bf16.msra.mxu0 %v688_v39 }
 0x3f0   : > { %1347 = vmatprep.subr.bf16.mxu0 %v1627_v0  ;;  %v940_v39 = vrot.slane %v1855_v8, %v939_v38 }
 0x3f1   : > { %v795_v42 = vpop.permute.xlu1 %794 }
 0x3f2   : > { %v800_v45 = vsel %vm462_vm10, %v795_v42, 0 }
 0x3f4   : > { %v1482_v40 = vpop.eup %1481 }
 0x3f5   : > { %v680_v41 = vmul.f32 %v1482_v40, %v1476_v23  ;;  %v1484_v44 = vpop.eup %1483  ;;  %v947_v40 = vsub.s32 3, %v1849_v6 }
 0x3f6   : > { %v792_v46 = vmul.f32 %v1484_v44, %v1474_v19 }
 0x3f7   : > { %v681_v43 = vpack.c.bf16 %v680_v41, %v680_v41  ;;  %v948_v42 = vrot.slane %v1855_v8, %v947_v40 }
 0x3f8   : > { %v793_v47 = vpack.c.bf16 %v792_v46, %v792_v46 }
 0x3f9   : > { %1338 = vmatmul.mubr.msk.bf16.vlgmr.msra.gmra.mrb[12].mxu0 %vm396_vm3, %v681_v43 }
 0x3fa   : > { %1348 = vmatpush3.bf16.msra.mxu0 %v800_v45  ;;  %1349 = vmatprep.mubr.msk.bf16.mxu0 %vm1628_vm0, %v1627_v0 }
 0x3fb   : > { %1361 = vmatprep.subr.bf16.mxu0 %v1627_v0 }
 0x401   : > { %1350 = vmatmul.mubr.msk.bf16.vlgmr.msra.gmra.mrb[16].mxu0 %vm396_vm3, %v793_v47  ;;  %v1467_v47 = vld [vmem:[#allocation5 + $0x40] sm:$0xff]  }
 0x402   : > { %1365 = vmatprep.mubr.msk.bf16.mxu0 %vm1628_vm0, %v1627_v0  ;;  %1362 = vmatpush3.bf16.msra.mxu0 %v1463_v28 }
 0x403   : > { %1363 = vmatprep.subr.bf16.mxu0 %v1627_v0 }
 0x406   : > { %1364 = vmatpush3.bf16.msra.mxu0 %v1464_v29 }
 0x497   : > { %v500_v48 = vpop.f32.mrb[4].mxu0 }
 0x498   : > { %v1315_v49 = vpop.f32.mrb[5].mxu0 }
 0x499   : > { %v503_v50 = vpop.f32.mrb[6].mxu0  ;;  %v953_v49 = vsub.s32 4, %v1849_v6 }
 0x49a   : > { %v1316_v51 = vpop.f32.mrb[7].mxu0 }
 0x49b   : > { %v954_v50 = vrot.slane %v1855_v8, %v953_v49 }
 0x4a8   : > { %v612_v52 = vpop.f32.mrb[8].mxu0 }
 0x4a9   : > { %843 = vrot.lane.b32.xlu0 %v612_v52, %s1641_s23  ;;  %v1327_v53 = vpop.f32.mrb[9].mxu0 }
 0x4aa   : > { %v615_v54 = vpop.f32.mrb[10].mxu0 }
 0x4ab   : > { %v1328_v55 = vpop.f32.mrb[11].mxu0 }
 0x4cc   : > { %v724_v58 = vpop.f32.mrb[12].mxu0 }
 0x4cd   : > { %847 = vrot.lane.b32.xlu1 %v724_v58, %s1642_s27  ;;  %v1339_v59 = vpop.f32.mrb[13].mxu0  ;;  %v1014_v58 = vsub.s32 5, %v1849_v6 }
 0x4ce   : > { %v727_v60 = vpop.f32.mrb[14].mxu0 }
 0x4cf   : > { %v1340_v61 = vpop.f32.mrb[15].mxu0  ;;  %v1015_v59 = vrot.slane %v1855_v8, %v1014_v58 }
 0x4d4   : > { %v836_v62 = vpop.f32.mrb[16].mxu0 }
 0x4d5   : > { %851 = vrot.lane.b32.xlu0 %v836_v62, %s1643_s11  ;;  %v1351_v63 = vpop.f32.mrb[17].mxu0 }
 0x4d6   : > { %v839_v1 = vpop.f32.mrb[18].mxu0 }
 0x4d7   : > { %v1352_v2 = vpop.f32.mrb[19].mxu0 }
 0x51b   : > { %v844_v4 = vpop.permute.xlu0 %843 }
 0x51c   : > { %v854_v7 = vsel %vm396_vm3, %v500_v48, %v844_v4  ;;  %v1468_v48 = vld [vmem:[#allocation5 + $0x48] sm:$0xff]  }
 0x53f   : > { %v848_v5 = vpop.permute.xlu1 %847 }
 0x540   : > { %v856_v9 = vsel %vm855_vm11, %v854_v7, %v848_v5 }
 0x547   : > { %v852_v10 = vpop.permute.xlu0 %851 }
 0x548   : > { %v858_v11 = vsel %vm857_vm12, %v856_v9, %v852_v10 }
 0x549   : > { %v859_v12 = vpack.c.bf16 %v858_v11, %v858_v11 }
 0x54b   : > { %1358 = vmatmul.mubr.msk.bf16.vlgmr.msra.gmra.mrb[16].mxu1 %vm326_vm1, %v859_v12 }
 0x54c   : > { %1377 = vmatprep.mubr.msk.bf16.mxu1 %vm1628_vm0, %v1627_v0  ;;  %1370 = vmatpush3.bf16.msra.mxu1 %v1465_v30 }
 0x54d   : > { %1371 = vmatprep.subr.bf16.mxu1 %v1627_v0 }
 0x550   : > { %1372 = vmatpush3.bf16.msra.mxu1 %v1466_v31 }
 0x551   : > { %1373 = vmatprep.subr.bf16.mxu1 %v1627_v0 }
 0x554   : > { %1374 = vmatpush3.bf16.msra.mxu1 %v1467_v47 }
 0x555   : > { %1375 = vmatprep.subr.bf16.mxu1 %v1627_v0 }
 0x558   : > { %1376 = vmatpush3.bf16.msra.mxu1 %v1468_v48 }
 0x61e   : > { %v913_v16 = vpop.f32.mrb[16].mxu1 }
 0x61f   : > { %v914_v17 = vadd.f32 %v913_v16, %v863_v15  ;;  %v1359_v18 = vpop.f32.mrb[17].mxu1 }
 0x620   : > { %v916_v19 = vpop.f32.mrb[18].mxu1 }
 0x621   : > { %v1360_v20 = vpop.f32.mrb[19].mxu1  ;;  %v919_v21 = vadd.f32 %v914_v17, %v1839_v3 }
 0x622   : > { %v1104_v20 = vsub.s32 6, %v1849_v6 }
 0x623   : > { %v920_v22 = vsel %vm326_vm1, %v919_v21, 0.0 }
 0x624   : > { %921 = vadd.xlane.f32.xlu1 %v920_v22  ;;  %v1112_v22 = vsub.s32 7, %v1849_v6 }
 0x6b1   : > { %v922_v23 = vpop.xlane.xlu1 %921 }
 0x6b2   : > { %v923_v24 = vmul.f32 0.03125, %v922_v23 }
 0x6b4   : > { %v924_v25 = vsub.f32 %v919_v21, %v923_v24  ;;  %v1105_v21 = vrot.slane %v1855_v8, %v1104_v20  ;;  %v1113_v24 = vrot.slane %v1855_v8, %v1112_v22 }
 0x6b6   : > { %v925_v26 = vmul.f32 %v924_v25, %v924_v25  ;;  %v941_v41 = vmul.f32 %v940_v39, %v924_v25 }
 0x6b8   : > { %v926_v27 = vsel %vm326_vm1, %v925_v26, 0.0 }
 0x6b9   : > { %927 = vadd.xlane.f32.xlu0 %v926_v27 }
 0x746   : > { %v928_v3 = vpop.xlane.xlu0 %927 }
 0x747   : > { %v929_v14 = vmul.f32 0.032258064, %v928_v3 }
 0x749   : > { %1485 = vrsqrt.f32 %v929_v14  ;;  %vm932_vm13 = vcmp.eq.f32.partialorder %v929_v14, inf  ;;  %v935_v34 = vand.u32 2147483648, %v929_v14  ;;  %vm934_vm14 = vcmp.eq.f32.partialorder %v929_v14, 0.0 }
 0x753   : > { %v1486_v32 = vpop.eup %1485 }
 0x754   : > { %v931_v33 = vmul.f32 %v1486_v32, %v929_v14 }
 0x756   : > { %v933_v35 = vsel %vm932_vm13, %v929_v14, %v931_v33 }
 0x757   : > { %v936_v36 = vsel %vm934_vm14, %v935_v34, %v933_v35 }
 0x758   : > { %v942_v37 = vadd.f32 1e-06, %v936_v36 }
 0x75a   : > { %1487 = vrcp.f32 %v942_v37 }
 0x764   : > { %v1488_v43 = vpop.eup %1487 }
 0x765   : > { %v944_v44 = vmul.f32 %v1488_v43, %v941_v41 }
 0x767   : > { %v949_v45 = vadd.f32 %v948_v42, %v944_v44 }
 0x769   : > { %v950_v46 = vpack.c.bf16 %v949_v45, %v949_v45 }
 0x76b   : > { %1366 = vmatmul.mubr.msk.bf16.vlgmr.msra.gmra.mrb[20].mxu0 %vm326_vm1, %v950_v46 }
 0x83e   : > { %v1004_v51 = vpop.f32.mrb[20].mxu0 }
 0x83f   : > { %v1005_v52 = vadd.f32 %v1004_v51, %v954_v50  ;;  %v1367_v53 = vpop.f32.mrb[21].mxu0 }
 0x840   : > { %v1007_v54 = vpop.f32.mrb[22].mxu0 }
 0x841   : > { %v1010_v55 = vmax.f32 %v1005_v52, 0.0  ;;  %v1368_v56 = vpop.f32.mrb[23].mxu0 }
 0x843   : > { %v1011_v57 = vpack.c.bf16 %v1010_v55, %v1010_v55 }
 0x845   : > { %1378 = vmatmul.mubr.msk.bf16.vlgmr.msra.gmra.mrb[20].mxu1 %vm1040_vm15, %v1011_v57 }
 0x918   : > { %v1078_v0 = vpop.f32.mrb[20].mxu1 }
 0x919   : > { %v1079_v60 = vadd.f32 %v1078_v0, %v1015_v59  ;;  %v1379_v61 = vpop.f32.mrb[21].mxu1 }
 0x91a   : > { %v1081_v62 = vpop.f32.mrb[22].mxu1 }
 0x91b   : > { %v1380_v63 = vpop.f32.mrb[23].mxu1  ;;  %v1084_v1 = vadd.f32 %v1079_v60, %v949_v45 }
 0x91d   : > { %v1085_v2 = vsel %vm326_vm1, %v1084_v1, 0.0 }
 0x91e   : > { %1086 = vadd.xlane.f32.xlu0 %v1085_v2 }
 0x9ab   : > { %v1087_v4 = vpop.xlane.xlu0 %1086 }
 0x9ac   : > { %v1088_v5 = vmul.f32 0.03125, %v1087_v4 }
 0x9ae   : > { %v1089_v7 = vsub.f32 %v1084_v1, %v1088_v5 }
 0x9b0   : > { %v1090_v9 = vmul.f32 %v1089_v7, %v1089_v7  ;;  %v1106_v23 = vmul.f32 %v1105_v21, %v1089_v7 }
 0x9b2   : > { %v1091_v10 = vsel %vm326_vm1, %v1090_v9, 0.0 }
 0x9b3   : > { %1092 = vadd.xlane.f32.xlu1 %v1091_v10 }
 0xa40   : > { %v1093_v11 = vpop.xlane.xlu1 %1092 }
 0xa41   : > { %v1094_v12 = vmul.f32 0.032258064, %v1093_v11 }
 0xa43   : > { %1489 = vrsqrt.f32 %v1094_v12  ;;  %vm1097_vm0 = vcmp.eq.f32.partialorder %v1094_v12, inf  ;;  %v1100_v16 = vand.u32 2147483648, %v1094_v12  ;;  %vm1099_vm2 = vcmp.eq.f32.partialorder %v1094_v12, 0.0 }
 0xa4d   : > { %v1490_v13 = vpop.eup %1489 }
 0xa4e   : > { %v1096_v15 = vmul.f32 %v1490_v13, %v1094_v12 }
 0xa50   : > { %v1098_v17 = vsel %vm1097_vm0, %v1094_v12, %v1096_v15 }
 0xa51   : > { %v1101_v18 = vsel %vm1099_vm2, %v1100_v16, %v1098_v17 }
 0xa52   : > { %v1107_v19 = vadd.f32 1e-06, %v1101_v18 }
 0xa54   : > { %1491 = vrcp.f32 %v1107_v19 }
 0xa5e   : > { %v1492_v25 = vpop.eup %1491 }
 0xa5f   : > { %v1109_v26 = vmul.f32 %v1492_v25, %v1106_v23 }
 0xa61   : > { %v1114_v27 = vadd.f32 %v1113_v24, %v1109_v26 }
 0xa63   : > { %1115 = vst.msk [vmem:[%s277_s29] sm:$0xff] %vm326_vm1, %v1114_v27 }
 0xa64   : > { %1564 = shalt.err (!%p1561_p9)
}
 0xa65   : > { %s1565_s15 = scalar_lea.hbm %s1976_s6, 128  ;;  %s1569_s27 = scalar_lea.hbm %s2026_s5, 256 }
 0xa66   : > { %p1566_p2 = scmp.ne.s32.totalorder %s1976_s6, %s1565_s15  ;;  %p1570_p1 = scmp.lt.u32.totalorder %s1976_s6, %s2026_s5 }
 0xa67   : > { %p1571_p11 = scmp.lt.u32.totalorder %s1569_s27, %s1565_s15  ;;  %p1573_p6 = scmp.lt.u32.totalorder %s1565_s15, %s1976_s6 }
 0xa68   : > { %p1567_p5 = pnand %p1566_p2, %p1766_p12 }
 0xa69   : > { %p1572_p4 = por %p1571_p11, %p1570_p1 }
 0xa6a   : > { %p1568_p0 = pneg %p1567_p5 }
 0xa6b   : > { %p1574_p8 = por %p1573_p6, %p1572_p4 }
 0xa6d   : > { %p1575_p10 = pnand %p1574_p8, %p1568_p0 }
 0xa6f   : > { %1578 = shalt.err (!%p1575_p10)
}
 0xa70   : > { %1387 = dma.vmem_to_hbm [thread:$0]  (%p1766_p12), %s1978_s28, 128, %s1976_s6, %s1117_s7  }
 0xa71 PF: > { %s1142_s12 = sand.u32 1, %s1609_s18   ;;  %p2043_p13 = scmp.ne.s32.totalorder %s2031_s25, 0 }
 0xa72   : > { %p2044_p3 = scmp.ge.s32.totalorder %s1621_s21, 2  ;;  %s1143_s29 = scalar_lea.sflag [#allocation4], %s1142_s12 }
 0xa74   : > { %p1398_p7 = pnand %p2044_p3, %p2043_p13 }
 0xa76   : > { %1604 = dma.done.wait (!%p1398_p7), %s1143_s29, 128  }
 0xa77   : > { %1606 = vsyncadd (!%p1398_p7), %s1143_s29, 4294967168  ;;  %p19_p9 = scmp.ge.s32.totalorder %s1731_s30, 4   ;;  %s2045_s18 = smov %s1613_s19 }
 0xa78   : > { %s2046_s19 = smov %s1617_s20  ;;  %s2047_s20 = smov %s1762_s8 }
 0xa79   : > { %s2048_s21 = smov %s1731_s30  ;;  %21 = sbr.rel (!%p19_p9) target bundleno = 6 (0x6), region = 95 }
 0xa80   :  { %1148 = vsyncpa [#allocation3], 1 }
 0xa81   :  { %1150 = vsyncpa [#allocation3 + $0x1], 1 }
 0xa82   :  { %1151 = vsyncpa [#allocation6], 1 }
 0xa83   :  { %1152 = vsyncpa [#allocation4], 1 }
 0xa84   :  { %1154 = vsyncpa [#allocation4 + $0x1], 1 }

</bundles_post_ra>
